<compile_context>
chip_gen: v6e
topology: v6e:2x2x1
jax: 0.10.0
libtpu: 0.0.40
codegen_flags: <defaults>
</compile_context>

<pallas_src>
import math

import jax
import jax.numpy as jnp
from jax.experimental import pallas as pl
from jax.experimental.pallas import tpu as pltpu


def _round_up(x, m):
    return (x + m - 1) // m * m


def _vmem_budget():
    """(resident-bytes budget, CompilerParams vmem_limit) per TPU generation."""
    phys = 64 * 1024 * 1024  # conservative default = v7x per-core VMEM
    try:
        info = pltpu.get_tpu_info()
        for name in ("vmem_capacity_bytes", "vmem_size_bytes", "vmem_bytes"):
            cap = getattr(info, name, None)
            if cap:
                phys = int(cap)
                break
    except Exception:
        pass
    if phys >= 100 * 1024 * 1024:           # v5e / v6e: 128 MiB physical
        return 80 * 1024 * 1024, 100 * 1024 * 1024
    return 40 * 1024 * 1024, 52 * 1024 * 1024   # v7x: 64 MiB physical


def _choose_tiles(n_pad, feat_cols, out_fp, cs, out_is, fixed_bytes,
                  resident_bufs, budget):
    """Pick (tm, tk): adjacency row tile and contraction tile.

    tk == n_pad means "no K tiling" (features fully resident).  Accounts for
    all VMEM-resident buffers: double-buffered adj tile, resident features,
    weight+bias, double-buffered output tile, and (K path) the f32 accumulator.
    """
    def row_tiles():
        for tm in (1024, 512, 256, 128):
            if tm > n_pad or n_pad % tm:
                continue
            if n_pad // tm < 2 and n_pad > 128:
                continue  # guarantee >= 2 row tiles (megacore split / pipelining)
            yield tm

    # Preferred: contraction axis fully resident, one matmul per row tile.
    for tm in row_tiles():
        need = (fixed_bytes
                + 2 * tm * n_pad * cs                     # adj (double buffered)
                + resident_bufs * n_pad * feat_cols * cs  # x / support resident
                + 2 * tm * out_fp * out_is)               # output (double buffered)
        if need <= budget:
            return tm, n_pad

    # Fallback: tile the contraction axis too; accumulate into f32 scratch.
    for tm in row_tiles():
        for tk in (2048, 1024, 512, 256, 128):
            if tk >= n_pad or n_pad % tk:
                continue
            need = (fixed_bytes
                    + 2 * tm * tk * cs                    # adj tile
                    + 2 * tk * feat_cols * cs             # features tile
                    + 2 * tm * out_fp * out_is            # output tile
                    + tm * feat_cols * 4)                 # f32 accumulator
            if need <= budget:
                return tm, tk
    return 128, min(128, n_pad)


# ----------------------------- kernels --------------------------------------
# Hoisted-support order: out_tile = adj_tile @ support + bias.
def _support_kernel(adj_ref, s_ref, b_ref, o_ref):
    out = jnp.dot(adj_ref[...], s_ref[...], preferred_element_type=jnp.float32)
    o_ref[...] = (out + b_ref[...]).astype(o_ref.dtype)


def _support_kernel_k(adj_ref, s_ref, b_ref, o_ref, acc_ref):
    k = pl.program_id(1)

    @pl.when(k == 0)
    def _():
        acc_ref[...] = jnp.zeros_like(acc_ref)

    acc_ref[...] += jnp.dot(adj_ref[...], s_ref[...],
                            preferred_element_type=jnp.float32)

    @pl.when(k == pl.num_programs(1) - 1)
    def _():
        o_ref[...] = (acc_ref[...] + b_ref[...]).astype(o_ref.dtype)


# Re-associated order: h = adj_tile @ x ; out_tile = h @ W + bias.
def _reassoc_kernel(adj_ref, x_ref, w_ref, b_ref, o_ref):
    h = jnp.dot(adj_ref[...], x_ref[...], preferred_element_type=jnp.float32)
    out = jnp.dot(h.astype(w_ref.dtype), w_ref[...],
                  preferred_element_type=jnp.float32)
    o_ref[...] = (out + b_ref[...]).astype(o_ref.dtype)


def _reassoc_kernel_k(adj_ref, x_ref, w_ref, b_ref, o_ref, acc_ref):
    k = pl.program_id(1)

    @pl.when(k == 0)
    def _():
        acc_ref[...] = jnp.zeros_like(acc_ref)

    acc_ref[...] += jnp.dot(adj_ref[...], x_ref[...],
                            preferred_element_type=jnp.float32)

    @pl.when(k == pl.num_programs(1) - 1)
    def _():
        out = jnp.dot(acc_ref[...].astype(w_ref.dtype), w_ref[...],
                      preferred_element_type=jnp.float32)
        o_ref[...] = (out + b_ref[...]).astype(o_ref.dtype)


# ----------------------------- wrapper ---------------------------------------
def gcn_forward(x, adj, weight, bias=None, *, compute_dtype=jnp.bfloat16,
                vmem_budget_bytes=None):
    """GCN layer forward: adj @ (x @ weight) + bias.

    compute_dtype is the MXU streaming precision for adj / features / weight
    (f32 accumulation always); pass jnp.float32 for full-precision streaming.
    """
    n, in_f = x.shape
    in_f_w, out_f = weight.shape
    assert in_f_w == in_f
    assert adj.shape == (n, n)
    out_dtype = x.dtype

    if bias is None:
        bias = jnp.zeros((out_f,), dtype=weight.dtype)

    n_pad = _round_up(n, 128)
    out_fp = _round_up(out_f, 128)
    in_fp = _round_up(in_f, 128)

    # Re-associate only when the lane-padded input width is strictly smaller:
    # ties cost the same MXU column blocks for the N^2 matmul but would add an
    # extra in-kernel h @ W, so prefer the hoisted-support order.
    reassociate = in_fp < out_fp
    feat_cols = in_fp if reassociate else out_fp

    budget, vmem_limit = _vmem_budget()
    if vmem_budget_bytes is not None:
        budget = vmem_budget_bytes

    cs = jnp.dtype(compute_dtype).itemsize
    out_is = jnp.dtype(out_dtype).itemsize
    w_bytes = in_fp * out_fp * cs if reassociate else 0
    bias_bytes = out_fp * 4

    # ---- padded / cast operands (zero padding contributes 0 and is sliced) ----
    adj_p = jnp.zeros((n_pad, n_pad), compute_dtype).at[:n, :n].set(
        adj.astype(compute_dtype))
    b_p = jnp.zeros((1, out_fp), jnp.float32).at[0, :out_f].set(
        bias.astype(jnp.float32))

    if reassociate:
        feats = jnp.zeros((n_pad, in_fp), compute_dtype).at[:n, :in_f].set(
            x.astype(compute_dtype))
        w_p = jnp.zeros((in_fp, out_fp), compute_dtype).at[:in_f, :out_f].set(
            weight.astype(compute_dtype))
    else:
        # Hoist support = X @ W to a plain XLA matmul (f32), feed as bf16 input.
        support = x.astype(jnp.float32) @ weight.astype(jnp.float32)
        feats = jnp.zeros((n_pad, out_fp), compute_dtype).at[:n, :out_f].set(
            support.astype(compute_dtype))
        w_p = None

    def run(resident_bufs, use_buffered):
        fixed = resident_bufs * (w_bytes + bias_bytes)
        tm, tk = _choose_tiles(n_pad, feat_cols, out_fp, cs, out_is,
                               fixed, resident_bufs, budget)
        k_tiled = tk < n_pad
        grid_rows = n_pad // tm

        def const_spec(shape):
            kwargs = {}
            if use_buffered:
                kwargs["pipeline_mode"] = pl.Buffered(1)
            return pl.BlockSpec(shape, lambda *_: (0,) * len(shape), **kwargs)

        if not k_tiled:
            grid = (grid_rows,)
            adj_spec = pl.BlockSpec((tm, n_pad), lambda i: (i, 0))
            feat_spec = const_spec((n_pad, feat_cols))
            out_spec = pl.BlockSpec((tm, out_fp), lambda i: (i, 0))
            scratch = []
            semantics = ("parallel",)
            kernel = _reassoc_kernel if reassociate else _support_kernel
        else:
            grid = (grid_rows, n_pad // tk)
            adj_spec = pl.BlockSpec((tm, tk), lambda i, k: (i, k))
            feat_spec = pl.BlockSpec((tk, feat_cols), lambda i, k: (k, 0))
            out_spec = pl.BlockSpec((tm, out_fp), lambda i, k: (i, 0))
            scratch = [pltpu.VMEM((tm, feat_cols), jnp.float32)]
            semantics = ("parallel", "arbitrary")
            kernel = _reassoc_kernel_k if reassociate else _support_kernel_k

        bias_spec = const_spec((1, out_fp))
        if reassociate:
            in_specs = [adj_spec, feat_spec, const_spec((in_fp, out_fp)), bias_spec]
            operands = (adj_p, feats, w_p, b_p)
        else:
            in_specs = [adj_spec, feat_spec, bias_spec]
            operands = (adj_p, feats, b_p)

        flops = 2 * n_pad * n_pad * feat_cols
        if reassociate:
            flops += 2 * n_pad * in_fp * out_fp
        bytes_accessed = sum(int(a.size) * a.dtype.itemsize for a in operands)
        bytes_accessed += n_pad * out_fp * out_is

        return pl.pallas_call(
            kernel,
            out_shape=jax.ShapeDtypeStruct((n_pad, out_fp), out_dtype),
            grid_spec=pltpu.PrefetchScalarGridSpec(
                num_scalar_prefetch=0,
                grid=grid,
                in_specs=in_specs,
                out_specs=out_spec,
                scratch_shapes=scratch,
            ),
            compiler_params=pltpu.CompilerParams(
                dimension_semantics=semantics,
                vmem_limit_bytes=vmem_limit,
            ),
            cost_estimate=pl.CostEstimate(
                flops=flops, transcendentals=0, bytes_accessed=bytes_accessed),
        )(*operands)

    try:
        out_p = run(resident_bufs=1, use_buffered=True)
    except Exception:
        # pl.Buffered(1) not supported by this jax version -> default buffering
        # (tile choice re-done with 2 buffers charged per resident input).
        out_p = run(resident_bufs=2, use_buffered=False)

    # Strip node-row and feature-column padding.
    return out_p[:n, :out_f]


# TODO(synk): optional fp8(e4m3)+scale adjacency stream on v7x (mem-bound win)
# left out pending accuracy validation.

if __name__ == "__main__":
    def init_params(key, in_f, out_f):
        # Mirrors reset_parameters(): uniform(-stdv, stdv), stdv = 1/sqrt(out_f).
        stdv = 1.0 / math.sqrt(out_f)
        kw, kb = jax.random.split(key)
        w = jax.random.uniform(kw, (in_f, out_f), jnp.float32,
                               minval=-stdv, maxval=stdv)
        b = jax.random.uniform(kb, (out_f,), jnp.float32,
                               minval=-stdv, maxval=stdv)
        return w, b

    def make_graph(key, n, in_f):
        kx, ka = jax.random.split(key)
        x = jax.random.normal(kx, (n, in_f), jnp.float32)
        a = (jax.random.uniform(ka, (n, n), jnp.float32) < 0.1).astype(jnp.float32)
        a = a + jnp.eye(n, dtype=jnp.float32)            # self loops
        a = a / jnp.sum(a, axis=1, keepdims=True)        # row-normalize
        return x, a

    key = jax.random.PRNGKey(0)
    k1, k2, k3, k4 = jax.random.split(key, 4)

    # Case 1: padded widths equal -> hoisted-support order (XLA X@W + adj matmul).
    N, IN, OUT = 128, 32, 64
    w, b = init_params(k1, IN, OUT)
    x, adj = make_graph(k2, N, IN)
    out = jax.block_until_ready(gcn_forward(x, adj, w, b))
    ref = adj @ (x @ w) + b[None, :]
    assert out.shape == (N, OUT)
    assert jnp.allclose(out, ref, atol=1e-2, rtol=1e-2), float(
        jnp.max(jnp.abs(out - ref)))

    # Case 2: padded in_f < padded out_f -> re-associated in-kernel (adj@x)@W.
    N2, IN2, OUT2 = 128, 32, 192
    w2, b2 = init_params(k3, IN2, OUT2)
    x2, adj2 = make_graph(k4, N2, IN2)
    out2 = jax.block_until_ready(gcn_forward(x2, adj2, w2, b2))
    ref2 = adj2 @ (x2 @ w2) + b2[None, :]
    assert jnp.allclose(out2, ref2, atol=1e-2, rtol=1e-2), float(
        jnp.max(jnp.abs(out2 - ref2)))

    # Case 3: small VMEM budget override to exercise the contraction-tiled
    # (K axis + f32 accumulator) path at small shapes.
    N3, IN3, OUT3 = 512, 48, 130
    w3, b3 = init_params(k1, IN3, OUT3)
    x3, adj3 = make_graph(k2, N3, IN3)
    out3 = jax.block_until_ready(
        gcn_forward(x3, adj3, w3, b3, vmem_budget_bytes=600_000))
    ref3 = adj3 @ (x3 @ w3) + b3[None, :]
    assert jnp.allclose(out3, ref3, atol=1e-2, rtol=1e-2), float(
        jnp.max(jnp.abs(out3 - ref3)))

    print("KERNEL_OK")
</pallas_src>

<mosaic_0001>
module attributes {stable_mosaic.version = 11 : i64} {
  func.func @_support_kernel(%arg0: i32, %arg1: memref<128x128xbf16, #tpu.memory_space<vmem>>, %arg2: memref<128x128xbf16, #tpu.memory_space<vmem>>, %arg3: memref<1x128xf32, #tpu.memory_space<vmem>>, %arg4: memref<128x128xf32, #tpu.memory_space<vmem>>) attributes {dimension_semantics = [#tpu.dimension_semantics<parallel>], iteration_bounds = array<i64: 1>, scalar_prefetch = 0 : i64, scratch_operands = 0 : i64, tpu.core_type = #tpu.core_type<tc>, window_params = [{transform_indices = @transform_0, window_bounds = array<i64: 128, 128>}, {pipeline_mode = #tpu.pipeline_mode<synchronous>, transform_indices = @transform_1, window_bounds = array<i64: 128, 128>}, {pipeline_mode = #tpu.pipeline_mode<synchronous>, transform_indices = @transform_2, window_bounds = array<i64: 1, 128>}, {transform_indices = @transform_3, window_bounds = array<i64: 128, 128>}]} {
    %c0 = arith.constant 0 : index
    %c0_0 = arith.constant 0 : index
    %0 = vector.load %arg1[%c0, %c0_0] : memref<128x128xbf16, #tpu.memory_space<vmem>>, vector<128x128xbf16>
    %c0_1 = arith.constant 0 : index
    %c0_2 = arith.constant 0 : index
    %1 = vector.load %arg2[%c0_1, %c0_2] : memref<128x128xbf16, #tpu.memory_space<vmem>>, vector<128x128xbf16>
    %cst = arith.constant dense<0.000000e+00> : vector<128x128xf32>
    %2 = tpu.matmul %0, %1, %cst {dimension_numbers = #tpu.dot_dimension_numbers<[1], [0], [0], [1], [0, 0, 1, 1], [], []>} : vector<128x128xbf16>, vector<128x128xbf16>, vector<128x128xf32> -> vector<128x128xf32>
    %c0_3 = arith.constant 0 : index
    %c0_4 = arith.constant 0 : index
    %3 = vector.load %arg3[%c0_3, %c0_4] : memref<1x128xf32, #tpu.memory_space<vmem>>, vector<1x128xf32>
    %4 = vector.broadcast %3 : vector<1x128xf32> to vector<128x128xf32>
    %5 = arith.addf %2, %4 : vector<128x128xf32>
    %c0_5 = arith.constant 0 : index
    %c0_6 = arith.constant 0 : index
    %6 = vector.load %arg4[%c0_5, %c0_6] : memref<128x128xf32, #tpu.memory_space<vmem>>, vector<128x128xf32>
    tpu.vector_store %arg4[%c0_5, %c0_6], %5 {strides = array<i32>} : memref<128x128xf32, #tpu.memory_space<vmem>>, vector<128x128xf32>,
    return
  }
  func.func @transform_0(%arg0: i32) -> (i32, i32) {
    %c0_i32 = arith.constant 0 : i32
    %c0_i32_0 = arith.constant 0 : i32
    return %arg0, %c0_i32 : i32, i32
  }
  func.func @transform_1(%arg0: i32) -> (i32, i32) {
    %c0_i32 = arith.constant 0 : i32
    %c0_i32_0 = arith.constant 0 : i32
    %c0_i32_1 = arith.constant 0 : i32
    return %c0_i32, %c0_i32_0 : i32, i32
  }
  func.func @transform_2(%arg0: i32) -> (i32, i32) {
    %c0_i32 = arith.constant 0 : i32
    %c0_i32_0 = arith.constant 0 : i32
    %c0_i32_1 = arith.constant 0 : i32
    return %c0_i32, %c0_i32_0 : i32, i32
  }
  func.func @transform_3(%arg0: i32) -> (i32, i32) {
    %c0_i32 = arith.constant 0 : i32
    %c0_i32_0 = arith.constant 0 : i32
    return %arg0, %c0_i32 : i32, i32
  }
}

module attributes {stable_mosaic.version = 11 : i64} {
  func.func @_support_kernel(%arg0: i32, %arg1: memref<128x128xbf16, #tpu.memory_space<vmem>>, %arg2: memref<128x128xbf16, #tpu.memory_space<vmem>>, %arg3: memref<1x128xf32, #tpu.memory_space<vmem>>, %arg4: memref<128x128xf32, #tpu.memory_space<vmem>>) attributes {dimension_semantics = [#tpu.dimension_semantics<parallel>], iteration_bounds = array<i64: 1>, scalar_prefetch = 0 : i64, scratch_operands = 0 : i64, tpu.core_type = #tpu.core_type<tc>, window_params = [{transform_indices = @transform_0, window_bounds = array<i64: 128, 128>}, {pipeline_mode = #tpu.pipeline_mode<synchronous>, transform_indices = @transform_1, window_bounds = array<i64: 128, 128>}, {pipeline_mode = #tpu.pipeline_mode<synchronous>, transform_indices = @transform_2, window_bounds = array<i64: 1, 128>}, {transform_indices = @transform_3, window_bounds = array<i64: 128, 128>}]} {
    %c0 = arith.constant 0 : index
    %c0_0 = arith.constant 0 : index
    %0 = vector.load %arg1[%c0, %c0_0] : memref<128x128xbf16, #tpu.memory_space<vmem>>, vector<128x128xbf16>
    %c0_1 = arith.constant 0 : index
    %c0_2 = arith.constant 0 : index
    %1 = vector.load %arg2[%c0_1, %c0_2] : memref<128x128xbf16, #tpu.memory_space<vmem>>, vector<128x128xbf16>
    %cst = arith.constant dense<0.000000e+00> : vector<128x128xf32>
    %2 = tpu.matmul %0, %1, %cst {dimension_numbers = #tpu.dot_dimension_numbers<[1], [0], [0], [1], [0, 0, 1, 1], [], []>} : vector<128x128xbf16>, vector<128x128xbf16>, vector<128x128xf32> -> vector<128x128xf32>
    %c0_3 = arith.constant 0 : index
    %c0_4 = arith.constant 0 : index
    %3 = vector.load %arg3[%c0_3, %c0_4] : memref<1x128xf32, #tpu.memory_space<vmem>>, vector<1x128xf32>
    %4 = vector.broadcast %3 : vector<1x128xf32> to vector<128x128xf32>
    %5 = arith.addf %2, %4 : vector<128x128xf32>
    %c0_5 = arith.constant 0 : index
    %c0_6 = arith.constant 0 : index
    %6 = vector.load %arg4[%c0_5, %c0_6] : memref<128x128xf32, #tpu.memory_space<vmem>>, vector<128x128xf32>
    tpu.vector_store %arg4[%c0_5, %c0_6], %5 {strides = array<i32>} : memref<128x128xf32, #tpu.memory_space<vmem>>, vector<128x128xf32>,
    return
  }
  func.func @transform_0(%arg0: i32) -> (i32, i32) {
    %c0_i32 = arith.constant 0 : i32
    %c0_i32_0 = arith.constant 0 : i32
    return %arg0, %c0_i32 : i32, i32
  }
  func.func @transform_1(%arg0: i32) -> (i32, i32) {
    %c0_i32 = arith.constant 0 : i32
    %c0_i32_0 = arith.constant 0 : i32
    %c0_i32_1 = arith.constant 0 : i32
    return %c0_i32, %c0_i32_0 : i32, i32
  }
  func.func @transform_2(%arg0: i32) -> (i32, i32) {
    %c0_i32 = arith.constant 0 : i32
    %c0_i32_0 = arith.constant 0 : i32
    %c0_i32_1 = arith.constant 0 : i32
    return %c0_i32, %c0_i32_0 : i32, i32
  }
  func.func @transform_3(%arg0: i32) -> (i32, i32) {
    %c0_i32 = arith.constant 0 : i32
    %c0_i32_0 = arith.constant 0 : i32
    return %arg0, %c0_i32 : i32, i32
  }
}

</mosaic_0001>

<bundles_post_ra>
// kernel: tpu_custom_call.1
= control target key start
LH: loop header
LB: loop body
LE: loop exit
PB: predicated region body
PF: predicated region fallthrough
CT: control target
= control target key end

     0   :  { %8 = vsyncpa [#allocation3], 0  ;;  %s519_s0 = inlined_call_operand.hbm [shape: bf16[128,128], index: 0, kind: input, shape index: {}]   ;;  %s520_s1 = inlined_call_operand.hbm [shape: bf16[128,128], index: 1, kind: input, shape index: {}]   ;;  %s521_s2 = inlined_call_operand.vmem [shape: f32[1,128], index: 2, kind: input, shape index: {}]   ;;  %s522_s3 = inlined_call_operand.hbm [shape: f32[128,128], index: 3, kind: output, shape index: {}]  }
   0x1   :  { %9 = vsyncpa [#allocation6], 0 }
   0x2   :  { %10 = vsyncpa [#allocation4], 0  ;;  %s480_s12 = smov [#allocation2]  }
   0x3   :  { %s16_s13 = sshll.u32 %s480_s12, 4  ;;  %s17_s13 = int_to_ptr.vmem [resolvable:$true] %s16_s13 }
   0x4   :  { %s422_s14 = scalar_lea.vmem %s17_s13, 1024  ;;  %p427_p1 = scmp.lt.s32.totalorder %s17_s13, %s17_s13 }
   0x5   :  { %p423_p0 = scmp.ne.s32.totalorder %s17_s13, %s422_s14  ;;  %p428_p2 = scmp.lt.s32.totalorder %s422_s14, %s422_s14 }
   0x7   :  { %p429_p3 = por %p428_p2, %p427_p1 }
   0x9   :  { %p430_p4 = pnand %p429_p3, %p423_p0 }
   0xb   :  { %433 = shalt.err (!%p430_p4)
}
   0xc   :  { %s481_s15 = smov 64   ;;  %s482_s16 = smov 4  }
   0xd   :  { %22 = dma.hbm_to_vmem [thread:$0]  %s519_s0, 1024, %s17_s13, [#allocation3], %s481_s15, %s481_s15, %s482_s16  }
   0xe   :  { %s483_s19 = smov [#allocation5]  }
   0xf   :  { %s28_s20 = sshll.u32 %s483_s19, 4  ;;  %s29_s20 = int_to_ptr.vmem [resolvable:$true] %s28_s20 }
  0x10   :  { %s442_s21 = scalar_lea.vmem %s29_s20, 1024  ;;  %p447_p6 = scmp.lt.s32.totalorder %s29_s20, %s29_s20 }
  0x11   :  { %p443_p5 = scmp.ne.s32.totalorder %s29_s20, %s442_s21  ;;  %p448_p7 = scmp.lt.s32.totalorder %s442_s21, %s442_s21 }
  0x13   :  { %p449_p8 = por %p448_p7, %p447_p6 }
  0x15   :  { %p450_p9 = pnand %p449_p8, %p443_p5 }
  0x17   :  { %453 = shalt.err (!%p450_p9)
}
  0x18   :  { %34 = dma.hbm_to_vmem [thread:$0]  %s520_s1, 1024, %s29_s20, [#allocation6], %s481_s15, %s481_s15, %s482_s16  }
  0x19   :  { %474 = dma.done.wait [#allocation3], 1024  }
  0x1a   :  { %475 = vsyncadd [#allocation3], 4294966272 }
  0x1b   :  { %476 = dma.done.wait [#allocation6], 1024  }
  0x1c   :  { %477 = vsyncadd [#allocation6], 4294966272  ;;  %v398_v0 = vld [vmem:[#allocation5 + $0x38] sm:$0xff]   ;;  %v399_v1 = vld [vmem:[#allocation5 + $0x30] sm:$0xff]  }
  0x1d   :  { %343 = vmatprep.subr.bf16.mxu0 %v398_v0  ;;  %375 = vmatprep.subr.bf16.mxu1 %v398_v0  ;;  %v400_v2 = vld [vmem:[#allocation5 + $0x28] sm:$0xff]   ;;  %v401_v3 = vld [vmem:[#allocation5 + $0x20] sm:$0xff]   ;;  %v402_v6 = vld [vmem:[#allocation5 + $0x18] sm:$0xff]  }
  0x1e   :  { %344 = vmatpush3.bf16.msra.mxu0 %v398_v0  ;;  %383 = vmatpush3.bf16.msra.mxu1 %v398_v0  ;;  %v406_v4 = vld [vmem:[#allocation2] sm:$0xff]   ;;  %v403_v7 = vld [vmem:[#allocation5 + $0x10] sm:$0xff]   ;;  %v404_v8 = vld [vmem:[#allocation5 + $0x8] sm:$0xff]  }
  0x1f   :  { %345 = vmatprep.subr.bf16.mxu0 %v399_v1  ;;  %376 = vmatprep.subr.bf16.mxu1 %v399_v1  ;;  %v407_v5 = vld [vmem:[#allocation2 + $0x20] sm:$0xff]   ;;  %v408_v10 = vld [vmem:[#allocation2 + $0x8] sm:$0xff]   ;;  %v410_v12 = vld [vmem:[#allocation2 + $0x10] sm:$0xff]  }
  0x20   :  { %359 = vmatprep.mubr.bf16.mxu0 %v406_v4  ;;  %367 = vmatprep.mubr.bf16.mxu1 %v407_v5  ;;  %v405_v9 = vld [vmem:[#allocation5] sm:$0xff]   ;;  %v409_v11 = vld [vmem:[#allocation2 + $0x28] sm:$0xff]   ;;  %v411_v13 = vld [vmem:[#allocation2 + $0x30] sm:$0xff]  }
  0x21   :  { %v412_v14 = vld [vmem:[#allocation2 + $0x18] sm:$0xff]   ;;  %v310_v16 = vld [vmem:[%s521_s2] ss:$0 sm:$0xff]  ;;  %s484_s2 = smov [#allocation7]  }
  0x22   :  { %346 = vmatpush3.bf16.msra.mxu0 %v399_v1  ;;  %384 = vmatpush3.bf16.msra.mxu1 %v399_v1  ;;  %v413_v15 = vld [vmem:[#allocation2 + $0x38] sm:$0xff]   ;;  %s297_s24 = sshll.u32 %s484_s2, 4  ;;  %s298_s24 = int_to_ptr.vmem [resolvable:$true] %s297_s24 }
  0x23   :  { %347 = vmatprep.subr.bf16.mxu0 %v400_v2  ;;  %377 = vmatprep.subr.bf16.mxu1 %v400_v2  ;;  %s454_s25 = scalar_lea.vmem %s298_s24, 2048  ;;  %p459_p11 = scmp.lt.s32.totalorder %s298_s24, %s298_s24 }
  0x24   :  { %p455_p10 = scmp.ne.s32.totalorder %s298_s24, %s454_s25  ;;  %p460_p12 = scmp.lt.s32.totalorder %s454_s25, %s454_s25 }
  0x26   :  { %348 = vmatpush3.bf16.msra.mxu0 %v400_v2  ;;  %385 = vmatpush3.bf16.msra.mxu1 %v400_v2  ;;  %p461_p13 = por %p460_p12, %p459_p11 }
  0x27   :  { %349 = vmatprep.subr.bf16.mxu0 %v401_v3  ;;  %378 = vmatprep.subr.bf16.mxu1 %v401_v3 }
  0x28   :  { %p462_p0 = pnand %p461_p13, %p455_p10 }
  0x2a   :  { %350 = vmatpush3.bf16.msra.mxu0 %v401_v3  ;;  %386 = vmatpush3.bf16.msra.mxu1 %v401_v3 }
  0x2b   :  { %351 = vmatprep.subr.bf16.mxu0 %v402_v6  ;;  %379 = vmatprep.subr.bf16.mxu1 %v402_v6 }
  0x2e   :  { %352 = vmatpush3.bf16.msra.mxu0 %v402_v6  ;;  %387 = vmatpush3.bf16.msra.mxu1 %v402_v6 }
  0x2f   :  { %353 = vmatprep.subr.bf16.mxu0 %v403_v7  ;;  %380 = vmatprep.subr.bf16.mxu1 %v403_v7 }
  0x32   :  { %354 = vmatpush3.bf16.msra.mxu0 %v403_v7  ;;  %388 = vmatpush3.bf16.msra.mxu1 %v403_v7 }
  0x33   :  { %355 = vmatprep.subr.bf16.mxu0 %v404_v8  ;;  %381 = vmatprep.subr.bf16.mxu1 %v404_v8 }
  0x36   :  { %356 = vmatpush3.bf16.msra.mxu0 %v404_v8  ;;  %389 = vmatpush3.bf16.msra.mxu1 %v404_v8 }
  0x37   :  { %357 = vmatprep.subr.bf16.mxu0 %v405_v9  ;;  %382 = vmatprep.subr.bf16.mxu1 %v405_v9 }
  0x3a   :  { %358 = vmatpush3.bf16.msra.mxu0 %v405_v9  ;;  %390 = vmatpush3.bf16.msra.mxu1 %v405_v9 }
  0x3d   :  { %360 = vmatmul.mubr.bf16.vlgmr.msra.gmra.mxu0 %v408_v10  ;;  %368 = vmatmul.mubr.bf16.vlgmr.msra.gmra.mxu1 %v409_v11 }
  0x3e   :  { %363 = vmatprep.mubr.bf16.mxu0 %v410_v12  ;;  %371 = vmatprep.mubr.bf16.mxu1 %v411_v13 }
  0x45   :  { %364 = vmatmul.mubr.bf16.gmra.mxu0 %v412_v14  ;;  %372 = vmatmul.mubr.bf16.gmra.mxu1 %v413_v15 }
  0xfd   :  { %v361_v17 = vpop.f32.mrf.mxu0  ;;  %v369_v18 = vpop.f32.mrf.mxu1 }
  0xfe   :  { %v222_v19 = vadd.f32 %v361_v17, %v310_v16  ;;  %v254_v20 = vadd.f32 %v369_v18, %v310_v16 }
  0xff   :  { %v213_v21 = vpop.f32.mrf.mxu0  ;;  %v245_v22 = vpop.f32.mrf.mxu1 }
 0x100   :  { %278 = vst [vmem:[#allocation7 + $0x10] sm:$0xff] %v222_v19  ;;  %286 = vst [vmem:[#allocation7 + $0x50] sm:$0xff] %v254_v20  ;;  %v214_v23 = vadd.f32 %v310_v16, %v213_v21  ;;  %v246_v24 = vadd.f32 %v310_v16, %v245_v22 }
 0x101   :  { %v362_v25 = vpop.f32.mrf.mxu0  ;;  %v370_v26 = vpop.f32.mrf.mxu1 }
 0x102   :  { %276 = vst [vmem:[#allocation7] sm:$0xff] %v214_v23  ;;  %284 = vst [vmem:[#allocation7 + $0x40] sm:$0xff] %v246_v24  ;;  %v225_v27 = vadd.f32 %v362_v25, %v310_v16  ;;  %v257_v28 = vadd.f32 %v370_v26, %v310_v16 }
 0x103   :  { %v216_v29 = vpop.f32.mrf.mxu0  ;;  %v248_v30 = vpop.f32.mrf.mxu1 }
 0x104   :  { %279 = vst [vmem:[#allocation7 + $0x18] sm:$0xff] %v225_v27  ;;  %287 = vst [vmem:[#allocation7 + $0x58] sm:$0xff] %v257_v28  ;;  %v217_v31 = vadd.f32 %v310_v16, %v216_v29  ;;  %v249_v32 = vadd.f32 %v310_v16, %v248_v30 }
 0x105   :  { %v365_v33 = vpop.f32.mrf.mxu0  ;;  %v373_v34 = vpop.f32.mrf.mxu1 }
 0x106   :  { %277 = vst [vmem:[#allocation7 + $0x8] sm:$0xff] %v217_v31  ;;  %285 = vst [vmem:[#allocation7 + $0x48] sm:$0xff] %v249_v32  ;;  %v238_v35 = vadd.f32 %v365_v33, %v310_v16  ;;  %v270_v36 = vadd.f32 %v373_v34, %v310_v16 }
 0x107   :  { %v229_v37 = vpop.f32.mrf.mxu0  ;;  %v261_v38 = vpop.f32.mrf.mxu1 }
 0x108   :  { %282 = vst [vmem:[#allocation7 + $0x30] sm:$0xff] %v238_v35  ;;  %290 = vst [vmem:[#allocation7 + $0x70] sm:$0xff] %v270_v36  ;;  %v230_v39 = vadd.f32 %v310_v16, %v229_v37  ;;  %v262_v40 = vadd.f32 %v310_v16, %v261_v38 }
 0x109   :  { %v366_v41 = vpop.f32.mrf.mxu0  ;;  %v374_v42 = vpop.f32.mrf.mxu1 }
 0x10a   :  { %280 = vst [vmem:[#allocation7 + $0x20] sm:$0xff] %v230_v39  ;;  %288 = vst [vmem:[#allocation7 + $0x60] sm:$0xff] %v262_v40  ;;  %v241_v43 = vadd.f32 %v366_v41, %v310_v16  ;;  %v273_v44 = vadd.f32 %v374_v42, %v310_v16 }
 0x10b   :  { %v232_v45 = vpop.f32.mrf.mxu0  ;;  %v264_v46 = vpop.f32.mrf.mxu1 }
 0x10c   :  { %283 = vst [vmem:[#allocation7 + $0x38] sm:$0xff] %v241_v43  ;;  %291 = vst [vmem:[#allocation7 + $0x78] sm:$0xff] %v273_v44  ;;  %v233_v47 = vadd.f32 %v310_v16, %v232_v45  ;;  %v265_v48 = vadd.f32 %v310_v16, %v264_v46 }
 0x10e   :  { %281 = vst [vmem:[#allocation7 + $0x28] sm:$0xff] %v233_v47  ;;  %289 = vst [vmem:[#allocation7 + $0x68] sm:$0xff] %v265_v48 }
 0x10f   :  { %465 = shalt.err (!%p462_p0)
}
 0x110   :  { %s485_s26 = smov 128   ;;  %s486_s27 = smov 8  }
 0x111   :  { %303 = dma.vmem_to_hbm [thread:$0]  %s298_s24, 2048, %s522_s3, [#allocation4], %s485_s26, %s485_s26, %s486_s27  }
 0x112   :  { %478 = dma.done.wait [#allocation4], 2048  }
 0x113   :  { %479 = vsyncadd [#allocation4], 4294965248 }
 0x114   :  { %307 = vsyncpa [#allocation3], 1 }
 0x115   :  { %308 = vsyncpa [#allocation6], 1 }
 0x116   :  { %309 = vsyncpa [#allocation4], 1 }

// kernel: tpu_custom_call.1
= control target key start
LH: loop header
LB: loop body
LE: loop exit
PB: predicated region body
PF: predicated region fallthrough
CT: control target
= control target key end

     0   :  { %8 = vsyncpa [#allocation3], 0  ;;  %s519_s0 = inlined_call_operand.hbm [shape: bf16[128,128], index: 0, kind: input, shape index: {}]   ;;  %s520_s1 = inlined_call_operand.hbm [shape: bf16[128,128], index: 1, kind: input, shape index: {}]   ;;  %s521_s2 = inlined_call_operand.vmem [shape: f32[1,128], index: 2, kind: input, shape index: {}]   ;;  %s522_s3 = inlined_call_operand.hbm [shape: f32[128,128], index: 3, kind: output, shape index: {}]  }
   0x1   :  { %9 = vsyncpa [#allocation6], 0 }
   0x2   :  { %10 = vsyncpa [#allocation4], 0  ;;  %s480_s12 = smov [#allocation2]  }
   0x3   :  { %s16_s13 = sshll.u32 %s480_s12, 4  ;;  %s17_s13 = int_to_ptr.vmem [resolvable:$true] %s16_s13 }
   0x4   :  { %s422_s14 = scalar_lea.vmem %s17_s13, 1024  ;;  %p427_p1 = scmp.lt.s32.totalorder %s17_s13, %s17_s13 }
   0x5   :  { %p423_p0 = scmp.ne.s32.totalorder %s17_s13, %s422_s14  ;;  %p428_p2 = scmp.lt.s32.totalorder %s422_s14, %s422_s14 }
   0x7   :  { %p429_p3 = por %p428_p2, %p427_p1 }
   0x9   :  { %p430_p4 = pnand %p429_p3, %p423_p0 }
   0xb   :  { %433 = shalt.err (!%p430_p4)
}
   0xc   :  { %s481_s15 = smov 64   ;;  %s482_s16 = smov 4  }
   0xd   :  { %22 = dma.hbm_to_vmem [thread:$0]  %s519_s0, 1024, %s17_s13, [#allocation3], %s481_s15, %s481_s15, %s482_s16  }
   0xe   :  { %s483_s19 = smov [#allocation5]  }
   0xf   :  { %s28_s20 = sshll.u32 %s483_s19, 4  ;;  %s29_s20 = int_to_ptr.vmem [resolvable:$true] %s28_s20 }
  0x10   :  { %s442_s21 = scalar_lea.vmem %s29_s20, 1024  ;;  %p447_p6 = scmp.lt.s32.totalorder %s29_s20, %s29_s20 }
  0x11   :  { %p443_p5 = scmp.ne.s32.totalorder %s29_s20, %s442_s21  ;;  %p448_p7 = scmp.lt.s32.totalorder %s442_s21, %s442_s21 }
  0x13   :  { %p449_p8 = por %p448_p7, %p447_p6 }
  0x15   :  { %p450_p9 = pnand %p449_p8, %p443_p5 }
  0x17   :  { %453 = shalt.err (!%p450_p9)
}
  0x18   :  { %34 = dma.hbm_to_vmem [thread:$0]  %s520_s1, 1024, %s29_s20, [#allocation6], %s481_s15, %s481_s15, %s482_s16  }
  0x19   :  { %474 = dma.done.wait [#allocation3], 1024  }
  0x1a   :  { %475 = vsyncadd [#allocation3], 4294966272 }
  0x1b   :  { %476 = dma.done.wait [#allocation6], 1024  }
  0x1c   :  { %477 = vsyncadd [#allocation6], 4294966272  ;;  %v398_v0 = vld [vmem:[#allocation5 + $0x38] sm:$0xff]   ;;  %v399_v1 = vld [vmem:[#allocation5 + $0x30] sm:$0xff]  }
  0x1d   :  { %343 = vmatprep.subr.bf16.mxu0 %v398_v0  ;;  %375 = vmatprep.subr.bf16.mxu1 %v398_v0  ;;  %v400_v2 = vld [vmem:[#allocation5 + $0x28] sm:$0xff]   ;;  %v401_v3 = vld [vmem:[#allocation5 + $0x20] sm:$0xff]   ;;  %v402_v6 = vld [vmem:[#allocation5 + $0x18] sm:$0xff]  }
  0x1e   :  { %344 = vmatpush3.bf16.msra.mxu0 %v398_v0  ;;  %383 = vmatpush3.bf16.msra.mxu1 %v398_v0  ;;  %v406_v4 = vld [vmem:[#allocation2] sm:$0xff]   ;;  %v403_v7 = vld [vmem:[#allocation5 + $0x10] sm:$0xff]   ;;  %v404_v8 = vld [vmem:[#allocation5 + $0x8] sm:$0xff]  }
  0x1f   :  { %345 = vmatprep.subr.bf16.mxu0 %v399_v1  ;;  %376 = vmatprep.subr.bf16.mxu1 %v399_v1  ;;  %v407_v5 = vld [vmem:[#allocation2 + $0x20] sm:$0xff]   ;;  %v408_v10 = vld [vmem:[#allocation2 + $0x8] sm:$0xff]   ;;  %v410_v12 = vld [vmem:[#allocation2 + $0x10] sm:$0xff]  }
  0x20   :  { %359 = vmatprep.mubr.bf16.mxu0 %v406_v4  ;;  %367 = vmatprep.mubr.bf16.mxu1 %v407_v5  ;;  %v405_v9 = vld [vmem:[#allocation5] sm:$0xff]   ;;  %v409_v11 = vld [vmem:[#allocation2 + $0x28] sm:$0xff]   ;;  %v411_v13 = vld [vmem:[#allocation2 + $0x30] sm:$0xff]  }
  0x21   :  { %v412_v14 = vld [vmem:[#allocation2 + $0x18] sm:$0xff]   ;;  %v310_v16 = vld [vmem:[%s521_s2] ss:$0 sm:$0xff]  ;;  %s484_s2 = smov [#allocation7]  }
  0x22   :  { %346 = vmatpush3.bf16.msra.mxu0 %v399_v1  ;;  %384 = vmatpush3.bf16.msra.mxu1 %v399_v1  ;;  %v413_v15 = vld [vmem:[#allocation2 + $0x38] sm:$0xff]   ;;  %s297_s24 = sshll.u32 %s484_s2, 4  ;;  %s298_s24 = int_to_ptr.vmem [resolvable:$true] %s297_s24 }
  0x23   :  { %347 = vmatprep.subr.bf16.mxu0 %v400_v2  ;;  %377 = vmatprep.subr.bf16.mxu1 %v400_v2  ;;  %s454_s25 = scalar_lea.vmem %s298_s24, 2048  ;;  %p459_p11 = scmp.lt.s32.totalorder %s298_s24, %s298_s24 }
  0x24   :  { %p455_p10 = scmp.ne.s32.totalorder %s298_s24, %s454_s25  ;;  %p460_p12 = scmp.lt.s32.totalorder %s454_s25, %s454_s25 }
  0x26   :  { %348 = vmatpush3.bf16.msra.mxu0 %v400_v2  ;;  %385 = vmatpush3.bf16.msra.mxu1 %v400_v2  ;;  %p461_p13 = por %p460_p12, %p459_p11 }
  0x27   :  { %349 = vmatprep.subr.bf16.mxu0 %v401_v3  ;;  %378 = vmatprep.subr.bf16.mxu1 %v401_v3 }
  0x28   :  { %p462_p0 = pnand %p461_p13, %p455_p10 }
  0x2a   :  { %350 = vmatpush3.bf16.msra.mxu0 %v401_v3  ;;  %386 = vmatpush3.bf16.msra.mxu1 %v401_v3 }
  0x2b   :  { %351 = vmatprep.subr.bf16.mxu0 %v402_v6  ;;  %379 = vmatprep.subr.bf16.mxu1 %v402_v6 }
  0x2e   :  { %352 = vmatpush3.bf16.msra.mxu0 %v402_v6  ;;  %387 = vmatpush3.bf16.msra.mxu1 %v402_v6 }
  0x2f   :  { %353 = vmatprep.subr.bf16.mxu0 %v403_v7  ;;  %380 = vmatprep.subr.bf16.mxu1 %v403_v7 }
  0x32   :  { %354 = vmatpush3.bf16.msra.mxu0 %v403_v7  ;;  %388 = vmatpush3.bf16.msra.mxu1 %v403_v7 }
  0x33   :  { %355 = vmatprep.subr.bf16.mxu0 %v404_v8  ;;  %381 = vmatprep.subr.bf16.mxu1 %v404_v8 }
  0x36   :  { %356 = vmatpush3.bf16.msra.mxu0 %v404_v8  ;;  %389 = vmatpush3.bf16.msra.mxu1 %v404_v8 }
  0x37   :  { %357 = vmatprep.subr.bf16.mxu0 %v405_v9  ;;  %382 = vmatprep.subr.bf16.mxu1 %v405_v9 }
  0x3a   :  { %358 = vmatpush3.bf16.msra.mxu0 %v405_v9  ;;  %390 = vmatpush3.bf16.msra.mxu1 %v405_v9 }
  0x3d   :  { %360 = vmatmul.mubr.bf16.vlgmr.msra.gmra.mxu0 %v408_v10  ;;  %368 = vmatmul.mubr.bf16.vlgmr.msra.gmra.mxu1 %v409_v11 }
  0x3e   :  { %363 = vmatprep.mubr.bf16.mxu0 %v410_v12  ;;  %371 = vmatprep.mubr.bf16.mxu1 %v411_v13 }
  0x45   :  { %364 = vmatmul.mubr.bf16.gmra.mxu0 %v412_v14  ;;  %372 = vmatmul.mubr.bf16.gmra.mxu1 %v413_v15 }
  0xfd   :  { %v361_v17 = vpop.f32.mrf.mxu0  ;;  %v369_v18 = vpop.f32.mrf.mxu1 }
  0xfe   :  { %v222_v19 = vadd.f32 %v361_v17, %v310_v16  ;;  %v254_v20 = vadd.f32 %v369_v18, %v310_v16 }
  0xff   :  { %v213_v21 = vpop.f32.mrf.mxu0  ;;  %v245_v22 = vpop.f32.mrf.mxu1 }
 0x100   :  { %278 = vst [vmem:[#allocation7 + $0x10] sm:$0xff] %v222_v19  ;;  %286 = vst [vmem:[#allocation7 + $0x50] sm:$0xff] %v254_v20  ;;  %v214_v23 = vadd.f32 %v310_v16, %v213_v21  ;;  %v246_v24 = vadd.f32 %v310_v16, %v245_v22 }
 0x101   :  { %v362_v25 = vpop.f32.mrf.mxu0  ;;  %v370_v26 = vpop.f32.mrf.mxu1 }
 0x102   :  { %276 = vst [vmem:[#allocation7] sm:$0xff] %v214_v23  ;;  %284 = vst [vmem:[#allocation7 + $0x40] sm:$0xff] %v246_v24  ;;  %v225_v27 = vadd.f32 %v362_v25, %v310_v16  ;;  %v257_v28 = vadd.f32 %v370_v26, %v310_v16 }
 0x103   :  { %v216_v29 = vpop.f32.mrf.mxu0  ;;  %v248_v30 = vpop.f32.mrf.mxu1 }
 0x104   :  { %279 = vst [vmem:[#allocation7 + $0x18] sm:$0xff] %v225_v27  ;;  %287 = vst [vmem:[#allocation7 + $0x58] sm:$0xff] %v257_v28  ;;  %v217_v31 = vadd.f32 %v310_v16, %v216_v29  ;;  %v249_v32 = vadd.f32 %v310_v16, %v248_v30 }
 0x105   :  { %v365_v33 = vpop.f32.mrf.mxu0  ;;  %v373_v34 = vpop.f32.mrf.mxu1 }
 0x106   :  { %277 = vst [vmem:[#allocation7 + $0x8] sm:$0xff] %v217_v31  ;;  %285 = vst [vmem:[#allocation7 + $0x48] sm:$0xff] %v249_v32  ;;  %v238_v35 = vadd.f32 %v365_v33, %v310_v16  ;;  %v270_v36 = vadd.f32 %v373_v34, %v310_v16 }
 0x107   :  { %v229_v37 = vpop.f32.mrf.mxu0  ;;  %v261_v38 = vpop.f32.mrf.mxu1 }
 0x108   :  { %282 = vst [vmem:[#allocation7 + $0x30] sm:$0xff] %v238_v35  ;;  %290 = vst [vmem:[#allocation7 + $0x70] sm:$0xff] %v270_v36  ;;  %v230_v39 = vadd.f32 %v310_v16, %v229_v37  ;;  %v262_v40 = vadd.f32 %v310_v16, %v261_v38 }
 0x109   :  { %v366_v41 = vpop.f32.mrf.mxu0  ;;  %v374_v42 = vpop.f32.mrf.mxu1 }
 0x10a   :  { %280 = vst [vmem:[#allocation7 + $0x20] sm:$0xff] %v230_v39  ;;  %288 = vst [vmem:[#allocation7 + $0x60] sm:$0xff] %v262_v40  ;;  %v241_v43 = vadd.f32 %v366_v41, %v310_v16  ;;  %v273_v44 = vadd.f32 %v374_v42, %v310_v16 }
 0x10b   :  { %v232_v45 = vpop.f32.mrf.mxu0  ;;  %v264_v46 = vpop.f32.mrf.mxu1 }
 0x10c   :  { %283 = vst [vmem:[#allocation7 + $0x38] sm:$0xff] %v241_v43  ;;  %291 = vst [vmem:[#allocation7 + $0x78] sm:$0xff] %v273_v44  ;;  %v233_v47 = vadd.f32 %v310_v16, %v232_v45  ;;  %v265_v48 = vadd.f32 %v310_v16, %v264_v46 }
 0x10e   :  { %281 = vst [vmem:[#allocation7 + $0x28] sm:$0xff] %v233_v47  ;;  %289 = vst [vmem:[#allocation7 + $0x68] sm:$0xff] %v265_v48 }
 0x10f   :  { %465 = shalt.err (!%p462_p0)
}
 0x110   :  { %s485_s26 = smov 128   ;;  %s486_s27 = smov 8  }
 0x111   :  { %303 = dma.vmem_to_hbm [thread:$0]  %s298_s24, 2048, %s522_s3, [#allocation4], %s485_s26, %s485_s26, %s486_s27  }
 0x112   :  { %478 = dma.done.wait [#allocation4], 2048  }
 0x113   :  { %479 = vsyncadd [#allocation4], 4294965248 }
 0x114   :  { %307 = vsyncpa [#allocation3], 1 }
 0x115   :  { %308 = vsyncpa [#allocation6], 1 }
 0x116   :  { %309 = vsyncpa [#allocation4], 1 }

</bundles_post_ra>
